<compile_context>
chip_gen: v7x
topology: tpu7x:2x2x1
jax: 0.10.0
libtpu: 0.0.40
codegen_flags: <defaults>
</compile_context>

<pallas_src>
import jax
import jax.numpy as jnp
from jax.experimental import pallas as pl
from jax.experimental.pallas import tpu as pltpu


# ----------------------------- Pallas kernel --------------------------------


def _make_kernel(reduce_head):
    """Build the fused forward kernel."""

    def kernel(x_ref,
               w1a_ref, b1a_ref, w1b_ref, b1b_ref,
               w2a_ref, b2a_ref, w2b_ref, b2b_ref,
               w3_ref, b3_ref, w4_ref, b4_ref,
               out_ref):
        # Activations arrive as bf16 (cheap DMA); elementwise path runs in f32
        # (v5e has no bf16 VPU), matmuls re-cast to bf16 for the MXU.
        x = x_ref[...].astype(jnp.float32)

        def leaky(v):
            # max(v, 0.01*v): 2 VALU ops instead of mul+cmp+select.
            return jnp.maximum(v, 0.01 * v)

        def lin(v, w_ref, b_ref):
            # bf16 MXU matmul, f32 accumulation; BN already folded into w/b.
            return jnp.dot(v.astype(jnp.bfloat16), w_ref[...],
                           preferred_element_type=jnp.float32) + b_ref[...]

        def residual_block(v, wa, ba, wb, bb):
            # Linear+BN(folded)+ReLU (+Dropout = identity in eval mode)
            h = jnp.maximum(lin(v, wa, ba), 0.0)
            # Linear+BN(folded), residual add in f32 on the VPU.
            return v + lin(h, wb, bb)

        h = leaky(residual_block(x, w1a_ref, b1a_ref, w1b_ref, b1b_ref))
        h = leaky(residual_block(h, w2a_ref, b2a_ref, w2b_ref, b2b_ref))
        h = leaky(lin(h, w3_ref, b3_ref))            # Linear(dim->H) + LeakyReLU

        if reduce_head:
            # Lane-dense head for out_dim == 1:
            #   w4_ref is the transposed head weight, zero-padded to (8, H) bf16.
            #   (8, H) x (tile_b, H)^T -> (8, tile_b); row 0 is the real result.
            # Output block is (1, tile_b): unmasked lane-dense store instead of
            # a 1-lane-wide masked column.
            rows = jax.lax.dot_general(
                w4_ref[...], h.astype(jnp.bfloat16),
                dimension_numbers=(((1,), (1,)), ((), ())),
                preferred_element_type=jnp.float32)          # (8, tile_b)
            out_ref[...] = (rows[0:1, :] + b4_ref[...]).astype(out_ref.dtype)
        else:
            # TODO(synk): for out_dim not a multiple of 128 this store stays
            # masked (vst.msk); acceptable while the output is small.
            out_ref[...] = lin(h, w4_ref, b4_ref).astype(out_ref.dtype)

    return kernel


# ------------------------------- wrapper -------------------------------------


def _round_up(x, m):
    return ((x + m - 1) // m) * m


def mlp_resnet_forward(feature_dict, params, *, tile_b=1024):
    """Fused forward pass.  feature_dict: {name: (B, fd)} f32 arrays."""
    names = list(feature_dict.keys())
    feats = [feature_dict[n] for n in names]
    B = int(feats[0].shape[0])
    dim = sum(int(f.shape[1]) for f in feats)
    hidden = int(params["w1a"].shape[1])
    out_dim = int(params["w4"].shape[1])
    reduce_head = (out_dim == 1)

    # Concat in the wrapper (one activation DMA per grid step) and ship bf16.
    x = jnp.concatenate(feats, axis=1).astype(jnp.bfloat16)   # (B, dim)

    # Batch tiling: pad to a multiple of 128, use the largest tile that fits
    # (per-step overhead ~0.35us -> bigger tiles = better HBM roofline), but
    # keep >= 2 grid steps when the batch allows so v7x's 2 TensorCores both
    # get work under dimension_semantics=("parallel",).
    b_pad = _round_up(B, 128)
    tile_b = min(_round_up(tile_b, 128), b_pad)
    if b_pad >= 256 and b_pad // tile_b < 2:
        tile_b = _round_up(b_pad // 2, 128)
    b_pad = _round_up(b_pad, tile_b)
    if b_pad != B:
        x = jnp.pad(x, ((0, b_pad - B), (0, 0)))
    grid = (b_pad // tile_b,)

    ops = [x]
    specs = [pl.BlockSpec((tile_b, dim), lambda i: (i, 0))]

    # Weights/biases: constant index_map -> DMA'd once, VMEM-resident across
    # grid steps.  Matmul weights stored in bf16, biases stay f32.
    def add_param(arr, to_bf16):
        a = arr.astype(jnp.bfloat16) if to_bf16 else arr
        ops.append(a)
        specs.append(pl.BlockSpec(a.shape, lambda i: (0, 0)))

    for nm in ("w1a", "b1a", "w1b", "b1b",
               "w2a", "b2a", "w2b", "b2b",
               "w3", "b3"):
        add_param(params[nm], nm.startswith("w"))
    if reduce_head:
        # Transposed head weight row, zero-padded to 8 sublanes (avoids M=1).
        w4t = jnp.zeros((8, hidden), jnp.float32).at[0].set(params["w4"][:, 0])
        add_param(w4t, True)
    else:
        add_param(params["w4"], True)
    add_param(params["b4"], False)

    kernel = _make_kernel(reduce_head)

    flops = 2 * b_pad * (5 * dim * hidden + hidden * out_dim)
    bytes_accessed = (sum(int(o.size) * o.dtype.itemsize for o in ops)
                      + b_pad * out_dim * 4)

    if reduce_head:
        out_shape = jax.ShapeDtypeStruct((1, b_pad), jnp.float32)
        out_spec = pl.BlockSpec((1, tile_b), lambda i: (0, i))
    else:
        out_shape = jax.ShapeDtypeStruct((b_pad, out_dim), jnp.float32)
        out_spec = pl.BlockSpec((tile_b, out_dim), lambda i: (i, 0))

    out = pl.pallas_call(
        kernel,
        out_shape=out_shape,
        grid=grid,
        in_specs=specs,
        out_specs=out_spec,
        compiler_params=pltpu.CompilerParams(
            dimension_semantics=("parallel",)),
        cost_estimate=pl.CostEstimate(
            flops=flops, transcendentals=0, bytes_accessed=bytes_accessed),
    )(*ops)

    if reduce_head:
        return out.T[:B]          # (1, b_pad) -> (B, 1)
    return out[:B]


# --------------------------- parameter construction --------------------------


def init_params(key, dim, hidden_dim, output_dim):
    """Synthetic parameters.  Linear weights are (in, out); BatchNorm running
    stats are folded into the adjacent Linear (eval-mode semantics)."""
    keys = jax.random.split(key, 40)
    kit = iter(keys)

    def linear(fan_in, fan_out):
        bound = float(fan_in) ** -0.5
        w = jax.random.uniform(next(kit), (fan_in, fan_out), jnp.float32, -bound, bound)
        b = jax.random.uniform(next(kit), (1, fan_out), jnp.float32, -bound, bound)
        return w, b

    def folded_linear_bn(fan_in, fan_out, eps=1e-5):
        w, b = linear(fan_in, fan_out)
        gamma = 1.0 + 0.1 * jax.random.normal(next(kit), (1, fan_out), jnp.float32)
        beta = 0.1 * jax.random.normal(next(kit), (1, fan_out), jnp.float32)
        mean = 0.1 * jax.random.normal(next(kit), (1, fan_out), jnp.float32)
        var = jnp.abs(1.0 + 0.1 * jax.random.normal(next(kit), (1, fan_out), jnp.float32))
        scale = gamma / jnp.sqrt(var + eps)
        shift = beta - mean * scale
        return w * scale, b * scale + shift

    p = {}
    # residual block 1
    p["w1a"], p["b1a"] = folded_linear_bn(dim, hidden_dim)
    p["w1b"], p["b1b"] = folded_linear_bn(hidden_dim, dim)
    # residual block 2
    p["w2a"], p["b2a"] = folded_linear_bn(dim, hidden_dim)
    p["w2b"], p["b2b"] = folded_linear_bn(hidden_dim, dim)
    # head
    p["w3"], p["b3"] = linear(dim, hidden_dim)
    p["w4"], p["b4"] = linear(hidden_dim, output_dim)
    return p


# --------------------------------- reference ---------------------------------


def reference_forward(feature_dict, p):
    """Pure-JAX reference mirroring the kernel numerics (bf16 activation DMA,
    bf16 matmul inputs, f32 accumulation, f32 elementwise)."""
    x = jnp.concatenate([feature_dict[n] for n in feature_dict], axis=1)
    x = x.astype(jnp.bfloat16).astype(jnp.float32)   # matches bf16 activation DMA

    def leaky(v):
        return jnp.maximum(v, 0.01 * v)

    def lin(v, w, b):
        return jnp.dot(v.astype(jnp.bfloat16), w.astype(jnp.bfloat16),
                       preferred_element_type=jnp.float32) + b

    def block(v, wa, ba, wb, bb):
        h = jnp.maximum(lin(v, wa, ba), 0.0)
        return v + lin(h, wb, bb)

    h = leaky(block(x, p["w1a"], p["b1a"], p["w1b"], p["b1b"]))
    h = leaky(block(h, p["w2a"], p["b2a"], p["w2b"], p["b2b"]))
    h = leaky(lin(h, p["w3"], p["b3"]))
    return lin(h, p["w4"], p["b4"])


# ----------------------------------- main ------------------------------------

if __name__ == "__main__":
    # feature_dims = {"user": 8, "item": 16, "context": 8}  -> dim = 32
    feature_dims = {"user": 8, "item": 16, "context": 8}
    dim = sum(feature_dims.values())
    hidden_dim = 128          # module default
    output_dim = 1
    batch = 256               # padded grid of 2 steps (both v7x cores get work)

    key = jax.random.PRNGKey(0)
    k_feat, k_param = jax.random.split(key)

    feat_keys = jax.random.split(k_feat, len(feature_dims))
    feature_dict = {
        name: jax.random.normal(fk, (batch, fd), jnp.float32)
        for (name, fd), fk in zip(feature_dims.items(), feat_keys)
    }

    params = init_params(k_param, dim, hidden_dim, output_dim)

    logits = mlp_resnet_forward(feature_dict, params)
    logits = jax.block_until_ready(logits)

    ref = reference_forward(feature_dict, params)
    assert logits.shape == (batch, output_dim)
    max_err = float(jnp.max(jnp.abs(logits - ref)))
    assert jnp.allclose(logits, ref, atol=1e-2, rtol=1e-2), (
        f"mismatch vs JAX reference, max abs err = {max_err}")

    print("KERNEL_OK")
</pallas_src>

<mosaic_0001>
module attributes {stable_mosaic.version = 11 : i64} {
  func.func @kernel(%arg0: i32, %arg1: memref<128x32xbf16, #tpu.memory_space<vmem>>, %arg2: memref<32x128xbf16, #tpu.memory_space<vmem>>, %arg3: memref<1x128xf32, #tpu.memory_space<vmem>>, %arg4: memref<128x32xbf16, #tpu.memory_space<vmem>>, %arg5: memref<1x32xf32, #tpu.memory_space<vmem>>, %arg6: memref<32x128xbf16, #tpu.memory_space<vmem>>, %arg7: memref<1x128xf32, #tpu.memory_space<vmem>>, %arg8: memref<128x32xbf16, #tpu.memory_space<vmem>>, %arg9: memref<1x32xf32, #tpu.memory_space<vmem>>, %arg10: memref<32x128xbf16, #tpu.memory_space<vmem>>, %arg11: memref<1x128xf32, #tpu.memory_space<vmem>>, %arg12: memref<8x128xbf16, #tpu.memory_space<vmem>>, %arg13: memref<1x1xf32, #tpu.memory_space<vmem>>, %arg14: memref<1x128xf32, #tpu.memory_space<vmem>>) attributes {dimension_semantics = [#tpu.dimension_semantics<parallel>], iteration_bounds = array<i64: 2>, scalar_prefetch = 0 : i64, scratch_operands = 0 : i64, tpu.core_type = #tpu.core_type<tc>, window_params = [{transform_indices = @transform_0, window_bounds = array<i64: 128, 32>}, {pipeline_mode = #tpu.pipeline_mode<synchronous>, transform_indices = @transform_1, window_bounds = array<i64: 32, 128>}, {pipeline_mode = #tpu.pipeline_mode<synchronous>, transform_indices = @transform_2, window_bounds = array<i64: 1, 128>}, {pipeline_mode = #tpu.pipeline_mode<synchronous>, transform_indices = @transform_3, window_bounds = array<i64: 128, 32>}, {pipeline_mode = #tpu.pipeline_mode<synchronous>, transform_indices = @transform_4, window_bounds = array<i64: 1, 32>}, {pipeline_mode = #tpu.pipeline_mode<synchronous>, transform_indices = @transform_5, window_bounds = array<i64: 32, 128>}, {pipeline_mode = #tpu.pipeline_mode<synchronous>, transform_indices = @transform_6, window_bounds = array<i64: 1, 128>}, {pipeline_mode = #tpu.pipeline_mode<synchronous>, transform_indices = @transform_7, window_bounds = array<i64: 128, 32>}, {pipeline_mode = #tpu.pipeline_mode<synchronous>, transform_indices = @transform_8, window_bounds = array<i64: 1, 32>}, {pipeline_mode = #tpu.pipeline_mode<synchronous>, transform_indices = @transform_9, window_bounds = array<i64: 32, 128>}, {pipeline_mode = #tpu.pipeline_mode<synchronous>, transform_indices = @transform_10, window_bounds = array<i64: 1, 128>}, {pipeline_mode = #tpu.pipeline_mode<synchronous>, transform_indices = @transform_11, window_bounds = array<i64: 8, 128>}, {pipeline_mode = #tpu.pipeline_mode<synchronous>, transform_indices = @transform_12, window_bounds = array<i64: 1, 1>}, {transform_indices = @transform_13, window_bounds = array<i64: 1, 128>}]} {
    %c0 = arith.constant 0 : index
    %c0_0 = arith.constant 0 : index
    %0 = vector.load %arg1[%c0, %c0_0] : memref<128x32xbf16, #tpu.memory_space<vmem>>, vector<128x32xbf16>
    %1 = arith.extf %0 : vector<128x32xbf16> to vector<128x32xf32>
    %2 = arith.truncf %1 : vector<128x32xf32> to vector<128x32xbf16>
    %c0_1 = arith.constant 0 : index
    %c0_2 = arith.constant 0 : index
    %3 = vector.load %arg2[%c0_1, %c0_2] : memref<32x128xbf16, #tpu.memory_space<vmem>>, vector<32x128xbf16>
    %cst = arith.constant dense<0.000000e+00> : vector<128x128xf32>
    %4 = tpu.matmul %2, %3, %cst {dimension_numbers = #tpu.dot_dimension_numbers<[1], [0], [0], [1], [0, 0, 1, 1], [], []>} : vector<128x32xbf16>, vector<32x128xbf16>, vector<128x128xf32> -> vector<128x128xf32>
    %c0_3 = arith.constant 0 : index
    %c0_4 = arith.constant 0 : index
    %5 = vector.load %arg3[%c0_3, %c0_4] : memref<1x128xf32, #tpu.memory_space<vmem>>, vector<1x128xf32>
    %6 = vector.broadcast %5 : vector<1x128xf32> to vector<128x128xf32>
    %7 = arith.addf %4, %6 : vector<128x128xf32>
    %cst_5 = arith.constant 0.000000e+00 : f32
    %8 = vector.broadcast %cst_5 : f32 to vector<128x128xf32>
    %9 = arith.maximumf %7, %8 : vector<128x128xf32>
    %10 = arith.truncf %9 : vector<128x128xf32> to vector<128x128xbf16>
    %c0_6 = arith.constant 0 : index
    %c0_7 = arith.constant 0 : index
    %11 = vector.load %arg4[%c0_6, %c0_7] : memref<128x32xbf16, #tpu.memory_space<vmem>>, vector<128x32xbf16>
    %cst_8 = arith.constant dense<0.000000e+00> : vector<128x32xf32>
    %12 = tpu.matmul %10, %11, %cst_8 {dimension_numbers = #tpu.dot_dimension_numbers<[1], [0], [0], [1], [0, 0, 1, 1], [], []>} : vector<128x128xbf16>, vector<128x32xbf16>, vector<128x32xf32> -> vector<128x32xf32>
    %c0_9 = arith.constant 0 : index
    %c0_10 = arith.constant 0 : index
    %13 = vector.load %arg5[%c0_9, %c0_10] : memref<1x32xf32, #tpu.memory_space<vmem>>, vector<1x32xf32>
    %14 = vector.broadcast %13 : vector<1x32xf32> to vector<128x32xf32>
    %15 = arith.addf %12, %14 : vector<128x32xf32>
    %16 = arith.addf %1, %15 : vector<128x32xf32>
    %cst_11 = arith.constant 0.00999999977 : f32
    %17 = vector.broadcast %cst_11 : f32 to vector<128x32xf32>
    %18 = arith.mulf %17, %16 : vector<128x32xf32>
    %19 = arith.maximumf %16, %18 : vector<128x32xf32>
    %20 = arith.truncf %19 : vector<128x32xf32> to vector<128x32xbf16>
    %c0_12 = arith.constant 0 : index
    %c0_13 = arith.constant 0 : index
    %21 = vector.load %arg6[%c0_12, %c0_13] : memref<32x128xbf16, #tpu.memory_space<vmem>>, vector<32x128xbf16>
    %cst_14 = arith.constant dense<0.000000e+00> : vector<128x128xf32>
    %22 = tpu.matmul %20, %21, %cst_14 {dimension_numbers = #tpu.dot_dimension_numbers<[1], [0], [0], [1], [0, 0, 1, 1], [], []>} : vector<128x32xbf16>, vector<32x128xbf16>, vector<128x128xf32> -> vector<128x128xf32>
    %c0_15 = arith.constant 0 : index
    %c0_16 = arith.constant 0 : index
    %23 = vector.load %arg7[%c0_15, %c0_16] : memref<1x128xf32, #tpu.memory_space<vmem>>, vector<1x128xf32>
    %24 = vector.broadcast %23 : vector<1x128xf32> to vector<128x128xf32>
    %25 = arith.addf %22, %24 : vector<128x128xf32>
    %cst_17 = arith.constant 0.000000e+00 : f32
    %26 = vector.broadcast %cst_17 : f32 to vector<128x128xf32>
    %27 = arith.maximumf %25, %26 : vector<128x128xf32>
    %28 = arith.truncf %27 : vector<128x128xf32> to vector<128x128xbf16>
    %c0_18 = arith.constant 0 : index
    %c0_19 = arith.constant 0 : index
    %29 = vector.load %arg8[%c0_18, %c0_19] : memref<128x32xbf16, #tpu.memory_space<vmem>>, vector<128x32xbf16>
    %cst_20 = arith.constant dense<0.000000e+00> : vector<128x32xf32>
    %30 = tpu.matmul %28, %29, %cst_20 {dimension_numbers = #tpu.dot_dimension_numbers<[1], [0], [0], [1], [0, 0, 1, 1], [], []>} : vector<128x128xbf16>, vector<128x32xbf16>, vector<128x32xf32> -> vector<128x32xf32>
    %c0_21 = arith.constant 0 : index
    %c0_22 = arith.constant 0 : index
    %31 = vector.load %arg9[%c0_21, %c0_22] : memref<1x32xf32, #tpu.memory_space<vmem>>, vector<1x32xf32>
    %32 = vector.broadcast %31 : vector<1x32xf32> to vector<128x32xf32>
    %33 = arith.addf %30, %32 : vector<128x32xf32>
    %34 = arith.addf %19, %33 : vector<128x32xf32>
    %cst_23 = arith.constant 0.00999999977 : f32
    %35 = vector.broadcast %cst_23 : f32 to vector<128x32xf32>
    %36 = arith.mulf %35, %34 : vector<128x32xf32>
    %37 = arith.maximumf %34, %36 : vector<128x32xf32>
    %38 = arith.truncf %37 : vector<128x32xf32> to vector<128x32xbf16>
    %c0_24 = arith.constant 0 : index
    %c0_25 = arith.constant 0 : index
    %39 = vector.load %arg10[%c0_24, %c0_25] : memref<32x128xbf16, #tpu.memory_space<vmem>>, vector<32x128xbf16>
    %cst_26 = arith.constant dense<0.000000e+00> : vector<128x128xf32>
    %40 = tpu.matmul %38, %39, %cst_26 {dimension_numbers = #tpu.dot_dimension_numbers<[1], [0], [0], [1], [0, 0, 1, 1], [], []>} : vector<128x32xbf16>, vector<32x128xbf16>, vector<128x128xf32> -> vector<128x128xf32>
    %c0_27 = arith.constant 0 : index
    %c0_28 = arith.constant 0 : index
    %41 = vector.load %arg11[%c0_27, %c0_28] : memref<1x128xf32, #tpu.memory_space<vmem>>, vector<1x128xf32>
    %42 = vector.broadcast %41 : vector<1x128xf32> to vector<128x128xf32>
    %43 = arith.addf %40, %42 : vector<128x128xf32>
    %cst_29 = arith.constant 0.00999999977 : f32
    %44 = vector.broadcast %cst_29 : f32 to vector<128x128xf32>
    %45 = arith.mulf %44, %43 : vector<128x128xf32>
    %46 = arith.maximumf %43, %45 : vector<128x128xf32>
    %c0_30 = arith.constant 0 : index
    %c0_31 = arith.constant 0 : index
    %47 = vector.load %arg12[%c0_30, %c0_31] : memref<8x128xbf16, #tpu.memory_space<vmem>>, vector<8x128xbf16>
    %48 = arith.truncf %46 : vector<128x128xf32> to vector<128x128xbf16>
    %cst_32 = arith.constant dense<0.000000e+00> : vector<8x128xf32>
    %49 = tpu.matmul %47, %48, %cst_32 {dimension_numbers = #tpu.dot_dimension_numbers<[1], [1], [0], [0], [0, 0, 1, 0], [], []>} : vector<8x128xbf16>, vector<128x128xbf16>, vector<8x128xf32> -> vector<8x128xf32>
    %50 = vector.extract_strided_slice %49 {offsets = [0, 0], sizes = [1, 128], strides = [1, 1]} : vector<8x128xf32> to vector<1x128xf32>
    %c0_33 = arith.constant 0 : index
    %c0_34 = arith.constant 0 : index
    %51 = vector.load %arg13[%c0_33, %c0_34] : memref<1x1xf32, #tpu.memory_space<vmem>>, vector<1x1xf32>
    %52 = vector.broadcast %51 : vector<1x1xf32> to vector<1x128xf32>
    %53 = arith.addf %50, %52 : vector<1x128xf32>
    %c0_35 = arith.constant 0 : index
    %c0_36 = arith.constant 0 : index
    %54 = vector.load %arg14[%c0_35, %c0_36] : memref<1x128xf32, #tpu.memory_space<vmem>>, vector<1x128xf32>
    tpu.vector_store %arg14[%c0_35, %c0_36], %53 {strides = array<i32>} : memref<1x128xf32, #tpu.memory_space<vmem>>, vector<1x128xf32>,
    return
  }
  func.func @transform_0(%arg0: i32) -> (i32, i32) {
    %c0_i32 = arith.constant 0 : i32
    %c0_i32_0 = arith.constant 0 : i32
    return %arg0, %c0_i32 : i32, i32
  }
  func.func @transform_1(%arg0: i32) -> (i32, i32) {
    %c0_i32 = arith.constant 0 : i32
    %c0_i32_0 = arith.constant 0 : i32
    %c0_i32_1 = arith.constant 0 : i32
    return %c0_i32, %c0_i32_0 : i32, i32
  }
  func.func @transform_2(%arg0: i32) -> (i32, i32) {
    %c0_i32 = arith.constant 0 : i32
    %c0_i32_0 = arith.constant 0 : i32
    %c0_i32_1 = arith.constant 0 : i32
    return %c0_i32, %c0_i32_0 : i32, i32
  }
  func.func @transform_3(%arg0: i32) -> (i32, i32) {
    %c0_i32 = arith.constant 0 : i32
    %c0_i32_0 = arith.constant 0 : i32
    %c0_i32_1 = arith.constant 0 : i32
    return %c0_i32, %c0_i32_0 : i32, i32
  }
  func.func @transform_4(%arg0: i32) -> (i32, i32) {
    %c0_i32 = arith.constant 0 : i32
    %c0_i32_0 = arith.constant 0 : i32
    %c0_i32_1 = arith.constant 0 : i32
    return %c0_i32, %c0_i32_0 : i32, i32
  }
  func.func @transform_5(%arg0: i32) -> (i32, i32) {
    %c0_i32 = arith.constant 0 : i32
    %c0_i32_0 = arith.constant 0 : i32
    %c0_i32_1 = arith.constant 0 : i32
    return %c0_i32, %c0_i32_0 : i32, i32
  }
  func.func @transform_6(%arg0: i32) -> (i32, i32) {
    %c0_i32 = arith.constant 0 : i32
    %c0_i32_0 = arith.constant 0 : i32
    %c0_i32_1 = arith.constant 0 : i32
    return %c0_i32, %c0_i32_0 : i32, i32
  }
  func.func @transform_7(%arg0: i32) -> (i32, i32) {
    %c0_i32 = arith.constant 0 : i32
    %c0_i32_0 = arith.constant 0 : i32
    %c0_i32_1 = arith.constant 0 : i32
    return %c0_i32, %c0_i32_0 : i32, i32
  }
  func.func @transform_8(%arg0: i32) -> (i32, i32) {
    %c0_i32 = arith.constant 0 : i32
    %c0_i32_0 = arith.constant 0 : i32
    %c0_i32_1 = arith.constant 0 : i32
    return %c0_i32, %c0_i32_0 : i32, i32
  }
  func.func @transform_9(%arg0: i32) -> (i32, i32) {
    %c0_i32 = arith.constant 0 : i32
    %c0_i32_0 = arith.constant 0 : i32
    %c0_i32_1 = arith.constant 0 : i32
    return %c0_i32, %c0_i32_0 : i32, i32
  }
  func.func @transform_10(%arg0: i32) -> (i32, i32) {
    %c0_i32 = arith.constant 0 : i32
    %c0_i32_0 = arith.constant 0 : i32
    %c0_i32_1 = arith.constant 0 : i32
    return %c0_i32, %c0_i32_0 : i32, i32
  }
  func.func @transform_11(%arg0: i32) -> (i32, i32) {
    %c0_i32 = arith.constant 0 : i32
    %c0_i32_0 = arith.constant 0 : i32
    %c0_i32_1 = arith.constant 0 : i32
    return %c0_i32, %c0_i32_0 : i32, i32
  }
  func.func @transform_12(%arg0: i32) -> (i32, i32) {
    %c0_i32 = arith.constant 0 : i32
    %c0_i32_0 = arith.constant 0 : i32
    %c0_i32_1 = arith.constant 0 : i32
    return %c0_i32, %c0_i32_0 : i32, i32
  }
  func.func @transform_13(%arg0: i32) -> (i32, i32) {
    %c0_i32 = arith.constant 0 : i32
    %c0_i32_0 = arith.constant 0 : i32
    return %c0_i32, %arg0 : i32, i32
  }
}

</mosaic_0001>

<bundles_post_ra>
// kernel: tpu_custom_call.1
= control target key start
LH: loop header
LB: loop body
LE: loop exit
PB: predicated region body
PF: predicated region fallthrough
CT: control target
= control target key end

     0   :  { %s2494_s0 = inlined_call_operand.vmem [shape: bf16[256,32], index: 0, kind: input, shape index: {}]   ;;  %s2495_s1 = inlined_call_operand.vmem [shape: bf16[32,128], index: 1, kind: input, shape index: {}]   ;;  %s2496_s2 = inlined_call_operand.vmem [shape: f32[1,128], index: 2, kind: input, shape index: {}]   ;;  %s2497_s3 = inlined_call_operand.vmem [shape: bf16[128,32], index: 3, kind: input, shape index: {}]   ;;  %s2498_s4 = inlined_call_operand.vmem [shape: f32[1,32], index: 4, kind: input, shape index: {}]   ;;  %s2499_s5 = inlined_call_operand.vmem [shape: bf16[32,128], index: 5, kind: input, shape index: {}]   ;;  %s2500_s6 = inlined_call_operand.vmem [shape: f32[1,128], index: 6, kind: input, shape index: {}]   ;;  %s2501_s7 = inlined_call_operand.vmem [shape: bf16[128,32], index: 7, kind: input, shape index: {}]   ;;  %s2502_s8 = inlined_call_operand.vmem [shape: f32[1,32], index: 8, kind: input, shape index: {}]   ;;  %s2503_s9 = inlined_call_operand.vmem [shape: bf16[32,128], index: 9, kind: input, shape index: {}]   ;;  %s2504_s10 = inlined_call_operand.vmem [shape: f32[1,128], index: 10, kind: input, shape index: {}]   ;;  %s2505_s11 = inlined_call_operand.vmem [shape: bf16[8,128], index: 11, kind: input, shape index: {}]   ;;  %s2506_s12 = inlined_call_operand.<no memory space> [shape: f32[1,1], index: 12, kind: input, shape index: {}]   ;;  %s2507_s13 = inlined_call_operand.hbm [shape: f32[1,256], index: 13, kind: output, shape index: {}]  }
   0x1   :  { %v18_v0 = vstv %s2506_s12 }
   0x2   :  { %19 = vst [vmem:[#allocation2] sm:$0x1] %v18_v0 }
   0x3   :  { %20 = vsyncpa [#allocation4], 0 }
   0x4   :  { %22 = vsyncpa [#allocation4 + $0x1], 0  ;;  %s2110_s27 = smov 0   ;;  %s2112_s28 = smov 0  }
   0x5   :  { %s2114_s29 = smov 0   ;;  %s2116_s30 = smov 0  }
   0x6 LB: > { %s1604_s12 = sadd.s32 4294967295, %s2031_s30   ;;  %s1605_s14 = sadd.s32 4294967294, %s2031_s30   ;;  %s2031_s30 = sphi %s2116_s30, %s2515_s30   ;;  %s2027_s29 = sphi %s2114_s29, %s2514_s29   ;;  %s2023_s28 = sphi %s2112_s28, %s2513_s28   ;;  %s2019_s27 = sphi %s2110_s27, %s2512_s27  }
   0x7   : > { %s2133_s15 = sadd.s32 1, %s2031_s30   ;;  %s313_s16 = sadd.s32 1, %s2027_s29 }
   0x8   : > { %s310_s17 = ssub.s32 %s2031_s30, %s2133_s15  ;;  %p323_p0 = scmp.ne.s32.totalorder %s2027_s29, %s2023_s28 }
   0x9   : > { %p311_p1 = scmp.eq.s32.totalorder %s310_s17, 0  ;;  %p324_p2 = scmp.eq.s32.totalorder %s1604_s12, 1 }
   0xa   : > { %p329_p3 = scmp.ne.s32.totalorder %s2023_s28, %s2019_s27  ;;  %p330_p4 = scmp.eq.s32.totalorder %s1605_s14, 1 }
   0xb   : > { %s2143_s18 = scalar_select %p311_p1, %s2027_s29, %s313_s16  }
   0xc   : > { %p2145_p5 = por %p324_p2, %p323_p0  ;;  %p2149_p6 = por %p330_p4, %p329_p3 }
   0xd   : > { %2508 = sst [smem:[#allocation6_spill]] %s2143_s18  ;;  %p1608_p7 = scmp.ge.s32.totalorder %s2031_s30, 1 }
   0xe   : > { %p393_p8 = scmp.lt.s32.totalorder %s2031_s30, 3 }
  0x10   : > { %p394_p9 = pnand %p1608_p7, %p393_p8 }
  0x11   : > { %v1931_v1 = vld [vmem:[%s2495_s1] sm:$0xff] (!%p394_p9)   ;;  %s2158_s23 = sshll.u32 (!%p394_p9), %s1604_s12, 4  ;;  %v1932_v2 = vld [vmem:[%s2495_s1 + $0x8] sm:$0xff] (!%p394_p9)   ;;  %v1943_v5 = vld [vmem:[%s2497_s3 + $0x10] sm:$0xff] (!%p394_p9)   ;;  %vm538_vm0 = vcmask (!%p394_p9), 261120   ;;  %vm2034_vm1 = vmmov (!%p394_p9), 0  }
  0x12   : > { %397 = sbr.rel (%p394_p9) target bundleno = 1441 (0x5a1), region = 72  ;;  %p437_p10 = scmp.lt.s32.totalorder (!%p394_p9), %s2158_s23, 31  ;;  %1744 = vmatprep.subr.bf16.mxu0 (!%p394_p9), %v1931_v1  ;;  %v1941_v3 = vld [vmem:[%s2497_s3] sm:$0xff] (!%p394_p9)   ;;  %v1942_v4 = vld [vmem:[%s2497_s3 + $0x8] sm:$0xff] (!%p394_p9)   ;;  %v1944_v9 = vld [vmem:[%s2497_s3 + $0x18] sm:$0xff] (!%p394_p9)  }
  0x13   : > { %1745 = vmatpush3.bf16.msra.mxu0 (!%p394_p9), %v1931_v1  ;;  %1764 = vmatprep.subr.bf16.mxu1 (!%p394_p9), %v1941_v3  ;;  %v1945_v12 = vld [vmem:[%s2497_s3 + $0x20] sm:$0xff] (!%p394_p9)   ;;  %v1946_v13 = vld [vmem:[%s2497_s3 + $0x28] sm:$0xff] (!%p394_p9)   ;;  %v1947_v17 = vld [vmem:[%s2497_s3 + $0x30] sm:$0xff] (!%p394_p9)   ;;  %s434_s22 = sand.u32 (!%p394_p9), 1, %s2023_s28  }
  0x14   : > { %1746 = vmatprep.subr.bf16.mxu0 (!%p394_p9), %v1932_v2  ;;  %1765 = vmatpush3.bf16.msra.mxu1 (!%p394_p9), %v1941_v3  ;;  %v1948_v18 = vld [vmem:[%s2497_s3 + $0x38] sm:$0xff] (!%p394_p9)   ;;  %v1949_v19 = vld [vmem:[%s2499_s5] sm:$0xff] (!%p394_p9)   ;;  %v1950_v20 = vld [vmem:[%s2499_s5 + $0x8] sm:$0xff] (!%p394_p9)   ;;  %s435_s25 = scalar_lea.vmem (!%p394_p9), [#allocation3], %s434_s22 }
  0x15   : > { %1766 = vmatprep.subr.bf16.mxu1 (!%p394_p9), %v1942_v4  ;;  %v1611_v21 = vld [vmem:[%s2496_s2] ss:$0 sm:$0xff] (!%p394_p9)  ;;  %s1550_s26 = sshll.u32 (!%p394_p9), %s435_s25, 4  ;;  %s2454_s26 = int_to_ptr.vmem [resolvable:$true] %s1550_s26 }
  0x16   : > { %s1969_s17 = scalar_lea.vmem (!%p394_p9), %s2454_s26, 16 }
  0x17   : > { %1747 = vmatpush3.bf16.msra.mxu0 (!%p394_p9), %v1932_v2  ;;  %p1970_p11 = scmp.ne.s32.totalorder (!%p394_p9), %s2454_s26, %s1969_s17 }
  0x18   : > { %1767 = vmatpush3.bf16.msra.mxu1 (!%p394_p9), %v1942_v4  ;;  %1796 = vmatprep.subr.bf16.mxu0 (!%p394_p9), %v1949_v19 }
  0x19   : > { %s438_s16 = scalar_select %p437_p10, %s2158_s23, 31  ;;  %1768 = vmatprep.subr.bf16.mxu1 %v1943_v5 }
  0x1a   : > { %p1971_p12 = pnand %p1970_p11, %p2145_p5 }
  0x1b   : > { %s1610_s12 = sshll.u32 %s438_s16, 2  ;;  %s2452_s16 = scalar_lea.hbm %s2507_s13, %s2158_s23 }
  0x1c   : > { %s2174_s24 = scalar_lea.vmem %s2494_s0, %s1610_s12  ;;  %1769 = vmatpush3.bf16.msra.mxu1 %v1943_v5  ;;  %p1972_p13 = pneg %p1971_p12 }
  0x1d   : > { %v2180_v6 = vld [vmem:[%s2174_s24] sm:$0xff]   ;;  %v2183_v7 = vld [vmem:[%s2174_s24 + $0x8] sm:$0xff]   ;;  %v2186_v8 = vld [vmem:[%s2174_s24 + $0x10] sm:$0xff]   ;;  %1770 = vmatprep.subr.bf16.mxu1 %v1944_v9  ;;  %s2036_s12 = smov [#allocation3]  }
  0x1e   : > { %1748 = vmatprep.mubr.msk.bf16.mxu0 %vm538_vm0, %v2180_v6  ;;  %v2194_v10 = vld [vmem:[%s2174_s24 + $0x18] sm:$0xff]   ;;  %v2199_v11 = vld [vmem:[%s2174_s24 + $0x20] sm:$0xff]   ;;  %v2214_v14 = vld [vmem:[%s2174_s24 + $0x28] sm:$0xff]   ;;  %s1973_s21 = sshll.u32 %s2036_s12, 4  ;;  %s1974_s21 = int_to_ptr.vmem [resolvable:$false] %s1973_s21 }
  0x1f   : > { %1749 = vmatmul.mubr.msk.bf16.vlgmr.msra.gmra.mrb[0].mxu0 %vm538_vm0, %v2183_v7  ;;  %v2217_v15 = vld [vmem:[%s2174_s24 + $0x30] sm:$0xff]   ;;  %v2224_v16 = vld [vmem:[%s2174_s24 + $0x38] sm:$0xff]   ;;  %s1538_s24 = scalar_lea.sflag [#allocation4], %s434_s22  ;;  %s1975_s18 = scalar_lea.vmem %s1974_s21, 32 }
  0x20   : > { %1752 = vmatprep.mubr.msk.bf16.mxu0 %vm538_vm0, %v2186_v8  ;;  %1771 = vmatpush3.bf16.msra.mxu1 %v1944_v9  ;;  %p1976_p0 = scmp.lt.s32.totalorder %s2454_s26, %s1974_s21  ;;  %p1977_p1 = scmp.lt.s32.totalorder %s1975_s18, %s1969_s17 }
  0x21   : > { %1772 = vmatprep.subr.bf16.mxu1 %v1945_v12  ;;  %1797 = vmatpush3.bf16.msra.mxu0 %v1949_v19 }
  0x22   : > { %1798 = vmatprep.subr.bf16.mxu0 %v1950_v20  ;;  %p1978_p2 = por %p1977_p1, %p1976_p0 }
  0x24   : > { %1773 = vmatpush3.bf16.msra.mxu1 %v1945_v12  ;;  %p1979_p3 = pnand %p1978_p2, %p1972_p13 }
  0x25   : > { %1774 = vmatprep.subr.bf16.mxu1 %v1946_v13  ;;  %1799 = vmatpush3.bf16.msra.mxu0 %v1950_v20 }
  0x27   : > { %1753 = vmatmul.mubr.msk.bf16.gmra.mrb[4].mxu0 %vm538_vm0, %v2194_v10 }
  0x28   : > { %1756 = vmatprep.mubr.msk.bf16.mxu0 %vm538_vm0, %v2199_v11  ;;  %1775 = vmatpush3.bf16.msra.mxu1 %v1946_v13 }
  0x29   : > { %1776 = vmatprep.subr.bf16.mxu1 %v1947_v17 }
  0x2c   : > { %1777 = vmatpush3.bf16.msra.mxu1 %v1947_v17 }
  0x2d   : > { %1778 = vmatprep.subr.bf16.mxu1 %v1948_v18 }
  0x2f   : > { %1757 = vmatmul.mubr.msk.bf16.gmra.mrb[8].mxu0 %vm538_vm0, %v2214_v14 }
  0x30   : > { %1760 = vmatprep.mubr.msk.bf16.mxu0 %vm538_vm0, %v2217_v15  ;;  %1779 = vmatpush3.bf16.msra.mxu1 %v1948_v18 }
  0x37   : > { %1761 = vmatmul.mubr.msk.bf16.gmra.mrb[12].mxu0 %vm538_vm0, %v2224_v16 }
  0xf2   : > { %v1750_v22 = vpop.f32.mrb[0].mxu0 }
  0xf3   : > { %v606_v23 = vadd.f32 %v1750_v22, %v1611_v21  ;;  %v597_v24 = vpop.f32.mrb[1].mxu0 }
  0xf4   : > { %v598_v25 = vadd.f32 %v1611_v21, %v597_v24  ;;  %v1751_v26 = vpop.f32.mrb[2].mxu0  ;;  %v1952_v24 = vld [vmem:[%s2501_s7 + $0x8] sm:$0xff]  }
  0xf5   : > { %v609_v27 = vadd.f32 %v1751_v26, %v1611_v21  ;;  %v600_v28 = vpop.f32.mrb[3].mxu0  ;;  %v662_v30 = vmax.f32 %v606_v23, 0.0  ;;  %v1951_v23 = vld [vmem:[%s2501_s7] sm:$0xff]  }
  0xf6   : > { %v601_v29 = vadd.f32 %v1611_v21, %v600_v28  ;;  %v660_v32 = vmax.f32 %v598_v25, 0.0  ;;  %1816 = vmatprep.subr.bf16.mxu1 %v1951_v23  ;;  %v1954_v25 = vld [vmem:[%s2501_s7 + $0x18] sm:$0xff]   ;;  %v1955_v26 = vld [vmem:[%s2501_s7 + $0x20] sm:$0xff]  }
  0xf7   : > { %v663_v31 = vmax.f32 %v609_v27, 0.0  ;;  %v1956_v27 = vld [vmem:[%s2501_s7 + $0x28] sm:$0xff]   ;;  %v2264_v28 = vld [vmem:[%s2498_s4] ss:$0 sm:$0xff] }
  0xf8   : > { %v661_v33 = vmax.f32 %v601_v29, 0.0  ;;  %v461_v29 = vunpack.c.l.bf16 %v2183_v7 }
  0xf9   : > { %v677_v34 = vpack.c.bf16 %v663_v31, %v662_v30  ;;  %v459_v30 = vunpack.c.l.bf16 %v2180_v6 }
  0xfa   : > { %v1754_v35 = vpop.f32.mrb[4].mxu0  ;;  %v676_v36 = vpack.c.bf16 %v661_v33, %v660_v32 }
  0xfb   : > { %v622_v37 = vadd.f32 %v1754_v35, %v1611_v21  ;;  %v613_v38 = vpop.f32.mrb[5].mxu0  ;;  %v460_v35 = vunpack.c.h.bf16 %v2180_v6  ;;  %v463_v6 = vunpack.c.l.bf16 %v2186_v8 }
  0xfc   : > { %v614_v39 = vadd.f32 %v1611_v21, %v613_v38  ;;  %v1755_v40 = vpop.f32.mrb[6].mxu0  ;;  %1780 = vmatprep.mubr.bf16.mxu1 %v676_v36 }
  0xfd   : > { %v666_v41 = vmax.f32 %v622_v37, 0.0  ;;  %v625_v42 = vadd.f32 %v1755_v40, %v1611_v21  ;;  %v616_v43 = vpop.f32.mrb[7].mxu0  ;;  %1781 = vmatmul.mubr.bf16.vlgmr.msra.gmra.mrb[0].mxu1 %v677_v34  ;;  %v462_v34 = vunpack.c.h.bf16 %v2183_v7 }
  0xfe   : > { %v664_v44 = vmax.f32 %v614_v39, 0.0  ;;  %v617_v45 = vadd.f32 %v1611_v21, %v616_v43  ;;  %1817 = vmatpush3.bf16.msra.mxu1 %v1951_v23 }
  0xff   : > { %v667_v46 = vmax.f32 %v625_v42, 0.0  ;;  %1818 = vmatprep.subr.bf16.mxu1 %v1952_v24 }
 0x100   : > { %v665_v47 = vmax.f32 %v617_v45, 0.0 }
 0x101   : > { %v679_v48 = vpack.c.bf16 %v667_v46, %v666_v41 }
 0x102   : > { %v678_v49 = vpack.c.bf16 %v665_v47, %v664_v44  ;;  %v1758_v50 = vpop.f32.mrb[8].mxu0  ;;  %1819 = vmatpush3.bf16.msra.mxu1 %v1952_v24  ;;  %v470_v24 = vunpack.c.h.bf16 %v2214_v14 }
 0x103   : > { %v638_v51 = vadd.f32 %v1758_v50, %v1611_v21  ;;  %v629_v52 = vpop.f32.mrb[9].mxu0 }
 0x104   : > { %v630_v53 = vadd.f32 %v1611_v21, %v629_v52  ;;  %v1759_v54 = vpop.f32.mrb[10].mxu0  ;;  %1784 = vmatprep.mubr.bf16.mxu1 %v678_v49 }
 0x105   : > { %v670_v55 = vmax.f32 %v638_v51, 0.0  ;;  %v641_v56 = vadd.f32 %v1759_v54, %v1611_v21  ;;  %v632_v57 = vpop.f32.mrb[11].mxu0  ;;  %1785 = vmatmul.mubr.bf16.gmra.mrb[4].mxu1 %v679_v48  ;;  %v465_v48 = vunpack.c.l.bf16 %v2194_v10 }
 0x106   : > { %v668_v58 = vmax.f32 %v630_v53, 0.0  ;;  %v633_v59 = vadd.f32 %v1611_v21, %v632_v57  ;;  %v466_v53 = vunpack.c.h.bf16 %v2194_v10 }
 0x107   : > { %v671_v60 = vmax.f32 %v641_v56, 0.0 }
 0x108   : > { %v669_v61 = vmax.f32 %v633_v59, 0.0 }
 0x109   : > { %v681_v62 = vpack.c.bf16 %v671_v60, %v670_v55 }
 0x10a   : > { %v680_v63 = vpack.c.bf16 %v669_v61, %v668_v58  ;;  %v1762_v0 = vpop.f32.mrb[12].mxu0  ;;  %v464_v58 = vunpack.c.h.bf16 %v2186_v8 }
 0x10b   : > { %v654_v1 = vadd.f32 %v1762_v0, %v1611_v21  ;;  %v645_v2 = vpop.f32.mrb[13].mxu0 }
 0x10c   : > { %v646_v3 = vadd.f32 %v1611_v21, %v645_v2  ;;  %v1763_v4 = vpop.f32.mrb[14].mxu0  ;;  %1788 = vmatprep.mubr.bf16.mxu1 %v680_v63 }
 0x10d   : > { %v674_v5 = vmax.f32 %v654_v1, 0.0  ;;  %v657_v9 = vadd.f32 %v1763_v4, %v1611_v21  ;;  %v648_v12 = vpop.f32.mrb[15].mxu0  ;;  %1789 = vmatmul.mubr.bf16.gmra.mrb[8].mxu1 %v681_v62 }
 0x10e   : > { %v672_v13 = vmax.f32 %v646_v3, 0.0  ;;  %v649_v17 = vadd.f32 %v1611_v21, %v648_v12  ;;  %v1953_v21 = vld [vmem:[%s2501_s7 + $0x10] sm:$0xff]  }
 0x10f   : > { %v675_v18 = vmax.f32 %v657_v9, 0.0  ;;  %1820 = vmatprep.subr.bf16.mxu1 %v1953_v21  ;;  %v469_v9 = vunpack.c.l.bf16 %v2214_v14 }
 0x110   : > { %v673_v19 = vmax.f32 %v649_v17, 0.0  ;;  %1821 = vmatpush3.bf16.msra.mxu1 %v1953_v21 }
 0x111   : > { %v683_v20 = vpack.c.bf16 %v675_v18, %v674_v5  ;;  %1822 = vmatprep.subr.bf16.mxu1 %v1954_v25  ;;  %v467_v18 = vunpack.c.l.bf16 %v2199_v11 }
 0x112   : > { %v682_v22 = vpack.c.bf16 %v673_v19, %v672_v13 }
 0x114   : > { %1792 = vmatprep.mubr.bf16.mxu1 %v682_v22  ;;  %1823 = vmatpush3.bf16.msra.mxu1 %v1954_v25 }
 0x115   : > { %1793 = vmatmul.mubr.bf16.gmra.mrb[12].mxu1 %v683_v20  ;;  %1824 = vmatprep.subr.bf16.mxu1 %v1955_v26 }
 0x118   : > { %1825 = vmatpush3.bf16.msra.mxu1 %v1955_v26 }
 0x119   : > { %1826 = vmatprep.subr.bf16.mxu1 %v1956_v27 }
 0x11c   : > { %1827 = vmatpush3.bf16.msra.mxu1 %v1956_v27  ;;  %v468_v27 = vunpack.c.h.bf16 %v2199_v11 }
 0x1d0   : > { %v1782_v31 = vpop.f32.mrb[0].mxu1 }
 0x1d1   : > { %v798_v32 = vadd.f32 %v1782_v31, %v2264_v28  ;;  %v789_v33 = vpop.f32.mrb[1].mxu1 }
 0x1d2   : > { %v790_v36 = vadd.f32 %v2264_v28, %v789_v33  ;;  %v1783_v37 = vpop.f32.mrb[2].mxu1 }
 0x1d3   : > { %v854_v38 = vadd.f32 %v798_v32, %v461_v29  ;;  %v801_v39 = vadd.f32 %v1783_v37, %v2264_v28  ;;  %v792_v40 = vpop.f32.mrb[3].mxu1 }
 0x1d4   : > { %v852_v41 = vadd.f32 %v790_v36, %v459_v30  ;;  %v793_v42 = vadd.f32 %v2264_v28, %v792_v40  ;;  %v473_v40 = vunpack.c.l.bf16 %v2224_v16 }
 0x1d5   : > { %v855_v43 = vadd.f32 %v801_v39, %v462_v34  ;;  %v870_v46 = vmul.f32 0.01, %v854_v38 }
 0x1d6   : > { %v868_v44 = vmul.f32 0.01, %v852_v41  ;;  %v853_v45 = vadd.f32 %v793_v42, %v460_v35 }
 0x1d7   : > { %v871_v47 = vmul.f32 0.01, %v855_v43  ;;  %v2286_v59 = vmax.f32 %v854_v38, %v870_v46 }
 0x1d8   : > { %v869_v7 = vmul.f32 0.01, %v853_v45  ;;  %v1786_v49 = vpop.f32.mrb[4].mxu1  ;;  %v2280_v54 = vmax.f32 %v852_v41, %v868_v44  ;;  %v471_v44 = vunpack.c.l.bf16 %v2217_v15 }
 0x1d9   : > { %v2276_v50 = vmax.f32 %v855_v43, %v871_v47  ;;  %v814_v51 = vadd.f32 %v1786_v49, %v2264_v28  ;;  %v805_v52 = vpop.f32.mrb[5].mxu1 }
 0x1da   : > { %v2282_v55 = vmax.f32 %v853_v45, %v869_v7  ;;  %v806_v56 = vadd.f32 %v2264_v28, %v805_v52  ;;  %v1787_v57 = vpop.f32.mrb[6].mxu1 }
 0x1db   : > { %v858_v60 = vadd.f32 %v814_v51, %v465_v48  ;;  %v817_v61 = vadd.f32 %v1787_v57, %v2264_v28  ;;  %v808_v62 = vpop.f32.mrb[7].mxu1  ;;  %v901_v1 = vpack.c.bf16 %v2276_v50, %v2286_v59  ;;  %v474_v48 = vunpack.c.h.bf16 %v2224_v16 }
 0x1dc   : > { %v900_v63 = vpack.c.bf16 %v2282_v55, %v2280_v54  ;;  %v856_v0 = vadd.f32 %v806_v56, %v463_v6  ;;  %v809_v10 = vadd.f32 %v2264_v28, %v808_v62  ;;  %v472_v51 = vunpack.c.h.bf16 %v2217_v15 }
 0x1dd   : > { %v874_v2 = vmul.f32 0.01, %v858_v60  ;;  %v859_v3 = vadd.f32 %v817_v61, %v466_v53 }
 0x1de   : > { %v872_v4 = vmul.f32 0.01, %v856_v0  ;;  %v857_v5 = vadd.f32 %v809_v10, %v464_v58  ;;  %1800 = vmatprep.mubr.msk.bf16.mxu0 %vm538_vm0, %v900_v63 }
 0x1df   : > { %v875_v8 = vmul.f32 0.01, %v859_v3  ;;  %1801 = vmatmul.mubr.msk.bf16.vlgmr.msra.gmra.mrb[16].mxu0 %vm538_vm0, %v901_v1  ;;  %v2300_v19 = vmax.f32 %v858_v60, %v874_v2 }
 0x1e0   : > { %v2297_v12 = vmax.f32 %v856_v0, %v872_v4  ;;  %v873_v13 = vmul.f32 0.01, %v857_v5  ;;  %v1790_v17 = vpop.f32.mrb[8].mxu1 }
 0x1e1   : > { %v2302_v20 = vmax.f32 %v859_v3, %v875_v8  ;;  %v830_v22 = vadd.f32 %v1790_v17, %v2264_v28  ;;  %v821_v23 = vpop.f32.mrb[9].mxu1  ;;  %v1957_v8 = vld [vmem:[%s2501_s7 + $0x30] sm:$0xff]   ;;  %v1960_v17 = vld [vmem:[%s2503_s9 + $0x8] sm:$0xff]  }
 0x1e2   : > { %v2306_v21 = vmax.f32 %v857_v5, %v873_v13  ;;  %v822_v25 = vadd.f32 %v2264_v28, %v821_v23  ;;  %v1791_v26 = vpop.f32.mrb[10].mxu1  ;;  %1828 = vmatprep.subr.bf16.mxu1 %v1957_v8  ;;  %v1959_v13 = vld [vmem:[%s2503_s9] sm:$0xff]  }
 0x1e3   : > { %v862_v29 = vadd.f32 %v830_v22, %v469_v9  ;;  %v833_v30 = vadd.f32 %v1791_v26, %v2264_v28  ;;  %v824_v31 = vpop.f32.mrb[11].mxu1  ;;  %v903_v14 = vpack.c.bf16 %v2302_v20, %v2300_v19  ;;  %1829 = vmatpush3.bf16.msra.mxu1 %v1957_v8  ;;  %v1958_v9 = vld [vmem:[%s2501_s7 + $0x38] sm:$0xff]   ;;  %1848 = vmatprep.subr.bf16.mxu0 %v1959_v13 }
 0x1e4   : > { %v902_v32 = vpack.c.bf16 %v2306_v21, %v2297_v12  ;;  %v860_v33 = vadd.f32 %v822_v25, %v467_v18  ;;  %v825_v34 = vadd.f32 %v2264_v28, %v824_v31  ;;  %1830 = vmatprep.subr.bf16.mxu1 %v1958_v9  ;;  %1849 = vmatpush3.bf16.msra.mxu0 %v1959_v13  ;;  %v1639_v18 = vld [vmem:[%s2500_s6] ss:$0 sm:$0xff] }
 0x1e5   : > { %v878_v35 = vmul.f32 0.01, %v862_v29  ;;  %v863_v36 = vadd.f32 %v833_v30, %v470_v24  ;;  %1850 = vmatprep.subr.bf16.mxu0 %v1960_v17 }
 0x1e6   : > { %v876_v37 = vmul.f32 0.01, %v860_v33  ;;  %v861_v38 = vadd.f32 %v825_v34, %v468_v27  ;;  %1804 = vmatprep.mubr.msk.bf16.mxu0 %vm538_vm0, %v902_v32 }
 0x1e7   : > { %v2317_v11 = vmax.f32 %v862_v29, %v878_v35  ;;  %v879_v39 = vmul.f32 0.01, %v863_v36  ;;  %1805 = vmatmul.mubr.msk.bf16.gmra.mrb[20].mxu0 %vm538_vm0, %v903_v14  ;;  %1831 = vmatpush3.bf16.msra.mxu1 %v1958_v9 }
 0x1e8   : > { %v2321_v41 = vmax.f32 %v860_v33, %v876_v37  ;;  %v877_v42 = vmul.f32 0.01, %v861_v38  ;;  %v1794_v43 = vpop.f32.mrb[12].mxu1  ;;  %1851 = vmatpush3.bf16.msra.mxu0 %v1960_v17 }
 0x1e9   : > { %v2324_v45 = vmax.f32 %v863_v36, %v879_v39  ;;  %v846_v46 = vadd.f32 %v1794_v43, %v2264_v28  ;;  %v837_v47 = vpop.f32.mrb[13].mxu1 }
 0x1ea   : > { %v2328_v7 = vmax.f32 %v861_v38, %v877_v42  ;;  %v838_v49 = vadd.f32 %v2264_v28, %v837_v47  ;;  %v1795_v6 = vpop.f32.mrb[14].mxu1 }
 0x1eb   : > { %v905_v52 = vpack.c.bf16 %v2324_v45, %v2317_v11  ;;  %v866_v53 = vadd.f32 %v846_v46, %v473_v40  ;;  %v849_v56 = vadd.f32 %v1795_v6, %v2264_v28  ;;  %v840_v57 = vpop.f32.mrb[15].mxu1 }
 0x1ec   : > { %v904_v58 = vpack.c.bf16 %v2328_v7, %v2321_v41  ;;  %v864_v60 = vadd.f32 %v838_v49, %v471_v44  ;;  %v841_v16 = vadd.f32 %v2264_v28, %v840_v57 }
 0x1ed   : > { %v882_v61 = vmul.f32 0.01, %v866_v53  ;;  %v867_v62 = vadd.f32 %v849_v56, %v474_v48 }
 0x1ee   : > { %v880_v63 = vmul.f32 0.01, %v864_v60  ;;  %v865_v0 = vadd.f32 %v841_v16, %v472_v51  ;;  %1808 = vmatprep.mubr.msk.bf16.mxu0 %vm538_vm0, %v904_v58 }
 0x1ef   : > { %v2339_v15 = vmax.f32 %v866_v53, %v882_v61  ;;  %v883_v10 = vmul.f32 0.01, %v867_v62  ;;  %1809 = vmatmul.mubr.msk.bf16.gmra.mrb[24].mxu0 %vm538_vm0, %v905_v52 }
 0x1f0   : > { %v2342_v1 = vmax.f32 %v864_v60, %v880_v63  ;;  %v881_v2 = vmul.f32 0.01, %v865_v0 }
 0x1f1   : > { %v2344_v3 = vmax.f32 %v867_v62, %v883_v10 }
 0x1f2   : > { %v2346_v4 = vmax.f32 %v865_v0, %v881_v2 }
 0x1f3   : > { %v907_v28 = vpack.c.bf16 %v2344_v3, %v2339_v15 }
 0x1f4   : > { %v906_v5 = vpack.c.bf16 %v2346_v4, %v2342_v1 }
 0x1f6   : > { %1812 = vmatprep.mubr.msk.bf16.mxu0 %vm538_vm0, %v906_v5 }
 0x1f7   : > { %1813 = vmatmul.mubr.msk.bf16.gmra.mrb[28].mxu0 %vm538_vm0, %v907_v28 }
 0x2b2   : > { %v1802_v22 = vpop.f32.mrb[16].mxu0 }
 0x2b3   : > { %v998_v23 = vadd.f32 %v1802_v22, %v1639_v18  ;;  %v989_v24 = vpop.f32.mrb[17].mxu0 }
 0x2b4   : > { %v990_v25 = vadd.f32 %v1639_v18, %v989_v24  ;;  %v1803_v26 = vpop.f32.mrb[18].mxu0 }
 0x2b5   : > { %v1001_v27 = vadd.f32 %v1803_v26, %v1639_v18  ;;  %v992_v29 = vpop.f32.mrb[19].mxu0  ;;  %v1054_v31 = vmax.f32 %v998_v23, 0.0 }
 0x2b6   : > { %v993_v30 = vadd.f32 %v1639_v18, %v992_v29  ;;  %v1052_v33 = vmax.f32 %v990_v25, 0.0 }
 0x2b7   : > { %v1055_v32 = vmax.f32 %v1001_v27, 0.0 }
 0x2b8   : > { %v1053_v34 = vmax.f32 %v993_v30, 0.0 }
 0x2b9   : > { %v1069_v14 = vpack.c.bf16 %v1055_v32, %v1054_v31  ;;  %v2372_v32 = vld [vmem:[%s2502_s8] ss:$0 sm:$0xff] }
 0x2ba   : > { %v1068_v35 = vpack.c.bf16 %v1053_v34, %v1052_v33  ;;  %v1806_v36 = vpop.f32.mrb[20].mxu0 }
 0x2bb   : > { %v1014_v37 = vadd.f32 %v1806_v36, %v1639_v18  ;;  %v1005_v38 = vpop.f32.mrb[21].mxu0 }
 0x2bc   : > { %v1006_v39 = vadd.f32 %v1639_v18, %v1005_v38  ;;  %v1807_v40 = vpop.f32.mrb[22].mxu0  ;;  %1832 = vmatprep.mubr.bf16.mxu1 %v1068_v35 }
 0x2bd   : > { %v1017_v42 = vadd.f32 %v1807_v40, %v1639_v18  ;;  %v1008_v43 = vpop.f32.mrb[23].mxu0  ;;  %1833 = vmatmul.mubr.bf16.vlgmr.msra.gmra.mrb[16].mxu1 %v1069_v14  ;;  %v1058_v46 = vmax.f32 %v1014_v37, 0.0 }
 0x2be   : > { %v1009_v44 = vadd.f32 %v1639_v18, %v1008_v43  ;;  %v1056_v48 = vmax.f32 %v1006_v39, 0.0 }
 0x2bf   : > { %v1059_v47 = vmax.f32 %v1017_v42, 0.0 }
 0x2c0   : > { %v1057_v49 = vmax.f32 %v1009_v44, 0.0 }
 0x2c1   : > { %v1071_v6 = vpack.c.bf16 %v1059_v47, %v1058_v46 }
 0x2c2   : > { %v1070_v51 = vpack.c.bf16 %v1057_v49, %v1056_v48  ;;  %v1810_v52 = vpop.f32.mrb[24].mxu0 }
 0x2c3   : > { %v1030_v53 = vadd.f32 %v1810_v52, %v1639_v18  ;;  %v1021_v56 = vpop.f32.mrb[25].mxu0 }
 0x2c4   : > { %v1022_v57 = vadd.f32 %v1639_v18, %v1021_v56  ;;  %v1811_v58 = vpop.f32.mrb[26].mxu0  ;;  %1836 = vmatprep.mubr.bf16.mxu1 %v1070_v51 }
 0x2c5   : > { %v1062_v60 = vmax.f32 %v1030_v53, 0.0  ;;  %v1033_v16 = vadd.f32 %v1811_v58, %v1639_v18  ;;  %v1024_v61 = vpop.f32.mrb[27].mxu0  ;;  %1837 = vmatmul.mubr.bf16.gmra.mrb[20].mxu1 %v1071_v6 }
 0x2c6   : > { %v1060_v62 = vmax.f32 %v1022_v57, 0.0  ;;  %v1025_v63 = vadd.f32 %v1639_v18, %v1024_v61 }
 0x2c7   : > { %v1063_v0 = vmax.f32 %v1033_v16, 0.0 }
 0x2c8   : > { %v1061_v10 = vmax.f32 %v1025_v63, 0.0 }
 0x2c9   : > { %v1073_v2 = vpack.c.bf16 %v1063_v0, %v1062_v60 }
 0x2ca   : > { %v1072_v28 = vpack.c.bf16 %v1061_v10, %v1060_v62  ;;  %v1814_v5 = vpop.f32.mrb[28].mxu0 }
 0x2cb   : > { %v1046_v8 = vadd.f32 %v1814_v5, %v1639_v18  ;;  %v1037_v9 = vpop.f32.mrb[29].mxu0 }
 0x2cc   : > { %v1038_v13 = vadd.f32 %v1639_v18, %v1037_v9  ;;  %v1815_v17 = vpop.f32.mrb[30].mxu0  ;;  %1840 = vmatprep.mubr.bf16.mxu1 %v1072_v28 }
 0x2cd   : > { %v1066_v22 = vmax.f32 %v1046_v8, 0.0  ;;  %v1049_v23 = vadd.f32 %v1815_v17, %v1639_v18  ;;  %v1040_v24 = vpop.f32.mrb[31].mxu0  ;;  %1841 = vmatmul.mubr.bf16.gmra.mrb[24].mxu1 %v1073_v2 }
 0x2ce   : > { %v1064_v25 = vmax.f32 %v1038_v13, 0.0  ;;  %v1041_v26 = vadd.f32 %v1639_v18, %v1040_v24 }
 0x2cf   : > { %v1067_v27 = vmax.f32 %v1049_v23, 0.0 }
 0x2d0   : > { %v1065_v29 = vmax.f32 %v1041_v26, 0.0 }
 0x2d1   : > { %v1075_v30 = vpack.c.bf16 %v1067_v27, %v1066_v22 }
 0x2d2   : > { %v1074_v31 = vpack.c.bf16 %v1065_v29, %v1064_v25 }
 0x2d4   : > { %1844 = vmatprep.mubr.bf16.mxu1 %v1074_v31 }
 0x2d5   : > { %1845 = vmatmul.mubr.bf16.gmra.mrb[28].mxu1 %v1075_v30 }
 0x390   : > { %v1834_v33 = vpop.f32.mrb[16].mxu1 }
 0x391   : > { %v1190_v34 = vadd.f32 %v1834_v33, %v2372_v32  ;;  %v1181_v14 = vpop.f32.mrb[17].mxu1 }
 0x392   : > { %v1182_v35 = vadd.f32 %v2372_v32, %v1181_v14  ;;  %v1835_v36 = vpop.f32.mrb[18].mxu1 }
 0x393   : > { %v1246_v18 = vadd.f32 %v1190_v34, %v2286_v59  ;;  %v1193_v37 = vadd.f32 %v1835_v36, %v2372_v32  ;;  %v1184_v38 = vpop.f32.mrb[19].mxu1 }
 0x394   : > { %v1244_v39 = vadd.f32 %v1182_v35, %v2280_v54  ;;  %v1185_v40 = vadd.f32 %v2372_v32, %v1184_v38 }
 0x395   : > { %v1262_v42 = vmul.f32 0.01, %v1246_v18  ;;  %v1247_v43 = vadd.f32 %v1193_v37, %v2276_v50 }
 0x396   : > { %v1260_v44 = vmul.f32 0.01, %v1244_v39  ;;  %v1245_v46 = vadd.f32 %v1185_v40, %v2282_v55 }
 0x397   : > { %v1263_v47 = vmul.f32 0.01, %v1247_v43  ;;  %v1278_v6 = vmax.f32 %v1246_v18, %v1262_v42 }
 0x398   : > { %v1261_v48 = vmul.f32 0.01, %v1245_v46  ;;  %v1838_v49 = vpop.f32.mrb[20].mxu1  ;;  %v1276_v53 = vmax.f32 %v1244_v39, %v1260_v44 }
 0x399   : > { %v1279_v51 = vmax.f32 %v1247_v43, %v1263_v47  ;;  %v1206_v59 = vadd.f32 %v1838_v49, %v2372_v32  ;;  %v1197_v52 = vpop.f32.mrb[21].mxu1 }
 0x39a   : > { %v1277_v56 = vmax.f32 %v1245_v46, %v1261_v48  ;;  %v1198_v54 = vadd.f32 %v2372_v32, %v1197_v52  ;;  %v1839_v57 = vpop.f32.mrb[22].mxu1 }
 0x39b   : > { %v1293_v58 = vpack.c.bf16 %v1279_v51, %v1278_v6  ;;  %v1250_v60 = vadd.f32 %v1206_v59, %v2300_v19  ;;  %v1209_v50 = vadd.f32 %v1839_v57, %v2372_v32  ;;  %v1200_v16 = vpop.f32.mrb[23].mxu1 }
 0x39c   : > { %v1292_v55 = vpack.c.bf16 %v1277_v56, %v1276_v53  ;;  %v1248_v61 = vadd.f32 %v1198_v54, %v2297_v12  ;;  %v1201_v62 = vadd.f32 %v2372_v32, %v1200_v16 }
 0x39d   : > { %v1266_v63 = vmul.f32 0.01, %v1250_v60  ;;  %v1251_v0 = vadd.f32 %v1209_v50, %v2302_v20  ;;  %v2419_v50 = vld [vmem:[%s2504_s10] ss:$0 sm:$0xff] }
 0x39e   : > { %v1264_v10 = vmul.f32 0.01, %v1248_v61  ;;  %v1249_v2 = vadd.f32 %v1201_v62, %v2306_v21  ;;  %1852 = vmatprep.mubr.msk.bf16.mxu0 %vm538_vm0, %v1292_v55 }
 0x39f   : > { %v1267_v28 = vmul.f32 0.01, %v1251_v0  ;;  %1853 = vmatmul.mubr.msk.bf16.vlgmr.msra.gmra.mrb[32].mxu0 %vm538_vm0, %v1293_v58  ;;  %v1282_v8 = vmax.f32 %v1250_v60, %v1266_v63 }
 0x3a0   : > { %v1265_v19 = vmul.f32 0.01, %v1249_v2  ;;  %v1842_v5 = vpop.f32.mrb[24].mxu1  ;;  %v1280_v17 = vmax.f32 %v1248_v61, %v1264_v10 }
 0x3a1   : > { %v1283_v9 = vmax.f32 %v1251_v0, %v1267_v28  ;;  %v1222_v13 = vadd.f32 %v1842_v5, %v2372_v32  ;;  %v1213_v12 = vpop.f32.mrb[25].mxu1 }
 0x3a2   : > { %v1281_v22 = vmax.f32 %v1249_v2, %v1265_v19  ;;  %v1214_v23 = vadd.f32 %v2372_v32, %v1213_v12  ;;  %v1843_v20 = vpop.f32.mrb[26].mxu1 }
 0x3a3   : > { %v1295_v24 = vpack.c.bf16 %v1283_v9, %v1282_v8  ;;  %v1254_v21 = vadd.f32 %v1222_v13, %v2317_v11  ;;  %v1225_v25 = vadd.f32 %v1843_v20, %v2372_v32  ;;  %v1216_v26 = vpop.f32.mrb[27].mxu1 }
 0x3a4   : > { %v1294_v27 = vpack.c.bf16 %v1281_v22, %v1280_v17  ;;  %v1252_v29 = vadd.f32 %v1214_v23, %v2321_v41  ;;  %v1217_v30 = vadd.f32 %v2372_v32, %v1216_v26 }
 0x3a5   : > { %v1270_v31 = vmul.f32 0.01, %v1254_v21  ;;  %v1255_v33 = vadd.f32 %v1225_v25, %v2324_v45 }
 0x3a6   : > { %v1268_v34 = vmul.f32 0.01, %v1252_v29  ;;  %v1253_v14 = vadd.f32 %v1217_v30, %v2328_v7  ;;  %1856 = vmatprep.mubr.msk.bf16.mxu0 %vm538_vm0, %v1294_v27 }
 0x3a7   : > { %v1271_v35 = vmul.f32 0.01, %v1255_v33  ;;  %1857 = vmatmul.mubr.msk.bf16.gmra.mrb[36].mxu0 %vm538_vm0, %v1295_v24  ;;  %v1286_v18 = vmax.f32 %v1254_v21, %v1270_v31 }
 0x3a8   : > { %v1269_v11 = vmul.f32 0.01, %v1253_v14  ;;  %v1846_v36 = vpop.f32.mrb[28].mxu1  ;;  %v1284_v39 = vmax.f32 %v1252_v29, %v1268_v34 }
 0x3a9   : > { %v1287_v37 = vmax.f32 %v1255_v33, %v1271_v35  ;;  %v1238_v38 = vadd.f32 %v1846_v36, %v2372_v32  ;;  %v1229_v41 = vpop.f32.mrb[29].mxu1 }
 0x3aa   : > { %v1285_v40 = vmax.f32 %v1253_v14, %v1269_v11  ;;  %v1230_v42 = vadd.f32 %v2372_v32, %v1229_v41  ;;  %v1847_v45 = vpop.f32.mrb[30].mxu1 }
 0x3ab   : > { %v1297_v43 = vpack.c.bf16 %v1287_v37, %v1286_v18  ;;  %v1258_v7 = vadd.f32 %v1238_v38, %v2339_v15  ;;  %v1241_v44 = vadd.f32 %v1847_v45, %v2372_v32  ;;  %v1232_v46 = vpop.f32.mrb[31].mxu1 }
 0x3ac   : > { %v1296_v47 = vpack.c.bf16 %v1285_v40, %v1284_v39  ;;  %v1256_v48 = vadd.f32 %v1230_v42, %v2342_v1  ;;  %v1233_v49 = vadd.f32 %v2372_v32, %v1232_v46  ;;  %v2035_v32 = vmov 0  }
 0x3ad   : > { %v1274_v6 = vmul.f32 0.01, %v1258_v7  ;;  %v1259_v51 = vadd.f32 %v1241_v44, %v2344_v3  ;;  %v2033_v3 = vmov 0.0   ;;  %1930 = vset.pattern.permute.xlu0 %v2035_v32 }
 0x3ae   : > { %v1272_v59 = vmul.f32 0.01, %v1256_v48  ;;  %v1257_v52 = vadd.f32 %v1233_v49, %v2346_v4  ;;  %1860 = vmatprep.mubr.msk.bf16.mxu0 %vm538_vm0, %v1296_v47  ;;  %1868 = vmatprep.subr.bf16.mxu1 %v2033_v3  ;;  %v1525_v4 = vld [vmem:[#allocation2] sm:$0x1] }
 0x3af   : > { %v1275_v53 = vmul.f32 0.01, %v1259_v51  ;;  %1861 = vmatmul.mubr.msk.bf16.gmra.mrb[40].mxu0 %vm538_vm0, %v1297_v43  ;;  %v1290_v56 = vmax.f32 %v1258_v7, %v1274_v6  ;;  %1884 = vmatprep.mubr.msk.bf16.mxu1 %vm2034_vm1, %v2033_v3 }
 0x3b0   : > { %v1273_v15 = vmul.f32 0.01, %v1257_v52  ;;  %v1288_v57 = vmax.f32 %v1256_v48, %v1272_v59  ;;  %1528 = vperm.xlu0 %1930, %v1525_v4  }
 0x3b1   : > { %v1291_v54 = vmax.f32 %v1259_v51, %v1275_v53 }
 0x3b2   : > { %v1289_v58 = vmax.f32 %v1257_v52, %v1273_v15 }
 0x3b3   : > { %v1299_v60 = vpack.c.bf16 %v1291_v54, %v1290_v56 }
 0x3b4   : > { %v1298_v1 = vpack.c.bf16 %v1289_v58, %v1288_v57 }
 0x3b6   : > { %1864 = vmatprep.mubr.msk.bf16.mxu0 %vm538_vm0, %v1298_v1 }
 0x3b7   : > { %1865 = vmatmul.mubr.msk.bf16.gmra.mrb[44].mxu0 %vm538_vm0, %v1299_v60 }
 0x472   : > { %v1854_v16 = vpop.f32.mrb[32].mxu0 }
 0x473   : > { %v1390_v55 = vadd.f32 %v1854_v16, %v2419_v50  ;;  %v1381_v61 = vpop.f32.mrb[33].mxu0 }
 0x474   : > { %v1382_v62 = vadd.f32 %v2419_v50, %v1381_v61  ;;  %v1855_v63 = vpop.f32.mrb[34].mxu0 }
 0x475   : > { %v1446_v0 = vmul.f32 0.01, %v1390_v55  ;;  %v1393_v10 = vadd.f32 %v1855_v63, %v2419_v50  ;;  %v1384_v2 = vpop.f32.mrb[35].mxu0 }
 0x476   : > { %v1444_v28 = vmul.f32 0.01, %v1382_v62  ;;  %v1385_v19 = vadd.f32 %v2419_v50, %v1384_v2 }
 0x477   : > { %v1447_v5 = vmul.f32 0.01, %v1393_v10  ;;  %v1462_v9 = vmax.f32 %v1390_v55, %v1446_v0 }
 0x478   : > { %v1445_v8 = vmul.f32 0.01, %v1385_v19  ;;  %v1460_v12 = vmax.f32 %v1382_v62, %v1444_v28 }
 0x479   : > { %v1463_v13 = vmax.f32 %v1393_v10, %v1447_v5  ;;  %v1531_v5 = vlaneseq }
 0x47a   : > { %v1461_v17 = vmax.f32 %v1385_v19, %v1445_v8  ;;  %v1858_v22 = vpop.f32.mrb[36].mxu0 }
 0x47b   : > { %v1478_v23 = vpack.c.bf16 %v1463_v13, %v1462_v9  ;;  %v1406_v20 = vadd.f32 %v1858_v22, %v2419_v50  ;;  %v1397_v24 = vpop.f32.mrb[37].mxu0  ;;  %v1532_v8 = vshrl.u32 %v1531_v5, 7  ;;  %v1529_v13 = vpop.permute.xlu0 %1528 }
 0x47c   : > { %v1477_v21 = vpack.c.bf16 %v1461_v17, %v1460_v12  ;;  %v1398_v25 = vadd.f32 %v2419_v50, %v1397_v24  ;;  %v1859_v26 = vpop.f32.mrb[38].mxu0 }
 0x47d   : > { %v1450_v27 = vmul.f32 0.01, %v1406_v20  ;;  %v1409_v29 = vadd.f32 %v1859_v26, %v2419_v50  ;;  %v1400_v30 = vpop.f32.mrb[39].mxu0  ;;  %v1533_v9 = vsub.s32 0, %v1532_v8 }
 0x47e   : > { %v1448_v31 = vmul.f32 0.01, %v1398_v25  ;;  %v1401_v33 = vadd.f32 %v2419_v50, %v1400_v30  ;;  %1869 = vmatpush3.bf16.xpose.msra.mxu1 %v1477_v21 }
 0x47f   : > { %v1451_v34 = vmul.f32 0.01, %v1409_v29  ;;  %1870 = vmatprep.subr.bf16.mxu1 %v2033_v3  ;;  %v1466_v35 = vmax.f32 %v1406_v20, %v1450_v27  ;;  %v1534_v12 = vrot.slane %v1529_v13, %v1533_v9 }
 0x480   : > { %v1449_v14 = vmul.f32 0.01, %v1401_v33  ;;  %v1464_v36 = vmax.f32 %v1398_v25, %v1448_v31 }
 0x481   : > { %v1467_v11 = vmax.f32 %v1409_v29, %v1451_v34 }
 0x482   : > { %v1465_v18 = vmax.f32 %v1401_v33, %v1449_v14  ;;  %v1862_v37 = vpop.f32.mrb[40].mxu0 }
 0x483   : > { %v1480_v38 = vpack.c.bf16 %v1467_v11, %v1466_v35  ;;  %v1422_v41 = vadd.f32 %v1862_v37, %v2419_v50  ;;  %v1413_v39 = vpop.f32.mrb[41].mxu0 }
 0x484   : > { %v1479_v40 = vpack.c.bf16 %v1465_v18, %v1464_v36  ;;  %v1414_v42 = vadd.f32 %v2419_v50, %v1413_v39  ;;  %v1863_v45 = vpop.f32.mrb[42].mxu0 }
 0x485   : > { %v1454_v43 = vmul.f32 0.01, %v1422_v41  ;;  %v1425_v7 = vadd.f32 %v1863_v45, %v2419_v50  ;;  %v1416_v44 = vpop.f32.mrb[43].mxu0 }
 0x486   : > { %v1452_v46 = vmul.f32 0.01, %v1414_v42  ;;  %v1417_v47 = vadd.f32 %v2419_v50, %v1416_v44  ;;  %1871 = vmatpush3.bf16.xpose.msra.mxu1 %v1478_v23 }
 0x487   : > { %v1455_v48 = vmul.f32 0.01, %v1425_v7  ;;  %1872 = vmatprep.subr.bf16.mxu1 %v2033_v3  ;;  %v1470_v6 = vmax.f32 %v1422_v41, %v1454_v43 }
 0x488   : > { %v1453_v49 = vmul.f32 0.01, %v1417_v47  ;;  %v1468_v59 = vmax.f32 %v1414_v42, %v1452_v46 }
 0x489   : > { %v1471_v51 = vmax.f32 %v1425_v7, %v1455_v48 }
 0x48a   : > { %v1469_v52 = vmax.f32 %v1417_v47, %v1453_v49  ;;  %v1866_v53 = vpop.f32.mrb[44].mxu0 }
 0x48b   : > { %v1482_v15 = vpack.c.bf16 %v1471_v51, %v1470_v6  ;;  %v1438_v56 = vadd.f32 %v1866_v53, %v2419_v50  ;;  %v1429_v54 = vpop.f32.mrb[45].mxu0 }
 0x48c   : > { %v1481_v57 = vpack.c.bf16 %v1469_v52, %v1468_v59  ;;  %v1430_v58 = vadd.f32 %v2419_v50, %v1429_v54  ;;  %v1867_v60 = vpop.f32.mrb[46].mxu0 }
 0x48d   : > { %v1458_v1 = vmul.f32 0.01, %v1438_v56  ;;  %v1441_v4 = vadd.f32 %v1867_v60, %v2419_v50  ;;  %v1432_v32 = vpop.f32.mrb[47].mxu0 }
 0x48e   : > { %v1456_v16 = vmul.f32 0.01, %v1430_v58  ;;  %v1433_v55 = vadd.f32 %v2419_v50, %v1432_v32  ;;  %1873 = vmatpush3.bf16.xpose.msra.mxu1 %v1479_v40  ;;  %v1476_v50 = vld [vmem:[%s2505_s11] sm:$0xf] }
 0x48f   : > { %v1459_v61 = vmul.f32 0.01, %v1441_v4  ;;  %1874 = vmatprep.subr.bf16.mxu1 %v2033_v3  ;;  %v1474_v63 = vmax.f32 %v1438_v56, %v1458_v1 }
 0x490   : > { %v1457_v62 = vmul.f32 0.01, %v1433_v55  ;;  %v1472_v10 = vmax.f32 %v1430_v58, %v1456_v16 }
 0x491   : > { %v1475_v0 = vmax.f32 %v1441_v4, %v1459_v61 }
 0x492   : > { %v1473_v2 = vmax.f32 %v1433_v55, %v1457_v62 }
 0x493   : > { %v1484_v28 = vpack.c.bf16 %v1475_v0, %v1474_v63 }
 0x494   : > { %v1483_v19 = vpack.c.bf16 %v1473_v2, %v1472_v10 }
 0x496   : > { %1875 = vmatpush3.bf16.xpose.msra.mxu1 %v1480_v38 }
 0x497   : > { %1876 = vmatprep.subr.bf16.mxu1 %v2033_v3 }
 0x49e   : > { %1877 = vmatpush3.bf16.xpose.msra.mxu1 %v1481_v57 }
 0x49f   : > { %1878 = vmatprep.subr.bf16.mxu1 %v2033_v3 }
 0x4a6   : > { %1879 = vmatpush3.bf16.xpose.msra.mxu1 %v1482_v15 }
 0x4a7   : > { %1880 = vmatprep.subr.bf16.mxu1 %v2033_v3 }
 0x4ae   : > { %1881 = vmatpush3.bf16.xpose.msra.mxu1 %v1483_v19 }
 0x4af   : > { %1882 = vmatprep.subr.bf16.mxu1 %v2033_v3 }
 0x4b6   : > { %1883 = vmatpush3.bf16.xpose.msra.mxu1 %v1484_v28 }
 0x4bd   : > { %1885 = vmatmul.mubr.bf16.vlgmr.msra.gmra.mrb[32].mxu1 %v1476_v50 }
 0x590   : > { %v1519_v17 = vpop.f32.mrb[32].mxu1 }
 0x591   : > { %v1535_v22 = vadd.f32 %v1534_v12, %v1519_v17  ;;  %v1886_v23 = vpop.f32.mrb[33].mxu1 }
 0x592   : > { %v1522_v3 = vpop.f32.mrb[34].mxu1 }
 0x593   : > { %1536 = vst [vmem:[%s435_s25] sm:$0x1] %v1535_v22  ;;  %v1887_v20 = vpop.f32.mrb[35].mxu1 }
 0x594   : > { %1982 = shalt.err (!%p1979_p3)
}
 0x595   : > { %s1983_s23 = scalar_lea.hbm %s2452_s16, 16  ;;  %s1987_s14 = scalar_lea.hbm %s2507_s13, 32 }
 0x596   : > { %p1984_p4 = scmp.ne.s32.totalorder %s2452_s16, %s1983_s23  ;;  %p1988_p9 = scmp.lt.u32.totalorder %s2452_s16, %s2507_s13 }
 0x597   : > { %p1989_p10 = scmp.lt.u32.totalorder %s1987_s14, %s1983_s23  ;;  %p1991_p12 = scmp.lt.u32.totalorder %s1983_s23, %s2452_s16 }
 0x598   : > { %p1985_p7 = pnand %p1984_p4, %p2145_p5 }
 0x599   : > { %p1990_p11 = por %p1989_p10, %p1988_p9 }
 0x59a   : > { %p1986_p8 = pneg %p1985_p7 }
 0x59b   : > { %p1992_p13 = por %p1991_p12, %p1990_p11 }
 0x59d   : > { %p1993_p0 = pnand %p1992_p13, %p1986_p8 }
 0x59f   : > { %1996 = shalt.err (!%p1993_p0)
}
 0x5a0   : > { %1888 = dma.vmem_to_hbm [thread:$0]  (%p2145_p5), %s2454_s26, 16, %s2452_s16, %s1538_s24  }
 0x5a1 PF: > { %p1894_p1 = scmp.ge.s32.totalorder %s2031_s30, 2  ;;  %s1562_s17 = sand.u32 1, %s2019_s27  }
 0x5a2   : > { %s1563_s18 = scalar_lea.sflag [#allocation4], %s1562_s17 }
 0x5a3   : > { %p1891_p2 = pnand %p1894_p1, %p2149_p6 }
 0x5a5   : > { %2014 = dma.done.wait (!%p1891_p2), %s1563_s18, 16  }
 0x5a6   : > { %2016 = vsyncadd (!%p1891_p2), %s1563_s18, 4294967280  ;;  %s2511_s23 = sld [smem:[#allocation6_spill]]  ;;  %p25_p3 = scmp.ge.s32.totalorder %s2133_s15, 4  }
 0x5a7   : > { %s2512_s27 = smov %s2023_s28  ;;  %s2513_s28 = smov %s2027_s29 }
 0x5a8   : > { %s2515_s30 = smov %s2133_s15  ;;  %27 = sbr.rel (!%p25_p3) target bundleno = 6 (0x6), region = 107 }
 0x5ac   : > { %s2514_s29 = smov %s2511_s23 }
 0x5af   :  { %1567 = vsyncpa [#allocation4], 1 }
 0x5b0   :  { %1569 = vsyncpa [#allocation4 + $0x1], 1 }

</bundles_post_ra>
